<compile_context>
chip_gen: v7x
topology: tpu7x:2x2x1
jax: 0.10.0
libtpu: 0.0.40
codegen_flags: <defaults>
</compile_context>

<pallas_src>
import jax
import jax.numpy as jnp
from jax import lax
from jax.experimental import pallas as pl
from jax.experimental.pallas import tpu as pltpu


def _nl_kernel(x_ref, wt_ref, bt_ref, wp_ref, bp_ref, o_ref):
    # x_ref:  (1, C, NT, TS)  full spatial extent of this batch element,
    #                         row-tile axis NT on sublanes, TS lane-dense.
    # wt_ref: (Ci, C) theta 1x1-conv weight    bt_ref: (Ci, 1) theta bias
    # wp_ref: (Ci, C) phi   1x1-conv weight    bp_ref: (Ci, 1) phi bias
    # o_ref:  (1, TS, S)      output rows of tile j, lane-dense full-S columns.
    nt = x_ref.shape[2]
    ts = x_ref.shape[3]

    wt = wt_ref[...]
    bt = bt_ref[...]
    wp = wp_ref[...]
    bp = bp_ref[...]

    # phi columns of THIS output-row tile: sublane-indexed view of the resident
    # x block (no duplicate HBM stream, no dynamic lane-offset slice).
    j = pl.program_id(1)
    xj = x_ref[0, :, j, :]                                          # (C, TS)
    phi_j = (jnp.dot(wp, xj, preferred_element_type=jnp.float32)
             + bp)                                                  # (Ci, TS)

    # theta over the full spatial extent, one lane-aligned chunk at a time
    # (static unroll; each chunk's result is stored at a static column offset).
    for m in range(nt):
        xm = x_ref[0, :, m, :]                                      # (C, TS)
        theta_m = (jnp.dot(wt, xm, preferred_element_type=jnp.float32)
                   + bt)                                            # (Ci, TS)
        # out_m[r, t] = sum_c phi_j[c, r] * theta_m[c, t]
        out_m = lax.dot_general(
            phi_j, theta_m,
            dimension_numbers=(((0,), (0,)), ((), ())),
            preferred_element_type=jnp.float32,
        )                                                           # (TS, TS)
        o_ref[0, :, pl.ds(m * ts, ts)] = out_m.astype(o_ref.dtype)


def _vmem_capacity_bytes():
    try:
        return int(pltpu.get_tpu_info().vmem_capacity_bytes)
    except Exception:
        return 64 << 20            # conservative fallback: v7x per-core VMEM


def _per_step_vmem_bytes(ts, S, C, Ci, out_itemsize):
    # The default BlockSpec pipeline double-buffers every block.
    out_bytes = 2 * ts * S * out_itemsize          # (1, TS, S) output tile
    x_bytes = 2 * C * S * 4                        # (1, C, NT, TS) f32
    w_bytes = 2 * (2 * Ci * C * 4 + 2 * Ci * 4)    # weights + biases
    return out_bytes + x_bytes + w_bytes


def _choose_row_tile(S, C, Ci, out_itemsize, row_tile, vmem_budget):
    """Largest lane-aligned output-row tile that fits the per-step VMEM budget."""
    if S % 128 == 0:
        cands = [t for t in range(128, min(row_tile, S) + 1, 128) if S % t == 0]
        for ts in sorted(cands, reverse=True):
            if _per_step_vmem_bytes(ts, S, C, Ci, out_itemsize) <= vmem_budget:
                return ts
        raise ValueError(
            f"NLBlockND kernel: even a 128-row output tile exceeds the VMEM "
            f"budget ({vmem_budget} B) at S={S}, C={C}; reduce the spatial "
            f"size or use bf16 output.")
    # S not a multiple of 128: the only lane-legal tiling is the full extent.
    # Treat an oversized full block as a configuration error rather than a
    # silent (S, S) fallback that OOMs VMEM at realistic sizes.
    if _per_step_vmem_bytes(S, S, C, Ci, out_itemsize) > vmem_budget:
        raise ValueError(
            f"NLBlockND kernel: S={S} (=H*W) is not a multiple of 128 and the "
            f"untiled (S, S) output block does not fit VMEM; choose spatial "
            f"dims with H*W a multiple of 128 (or pad).")
    return S


def nl_block_forward(x_nchw, w_theta, b_theta, w_phi, b_phi, *,
                     row_tile=512, out_dtype=None):
    """Pallas forward of the (truncated) NLBlockND.forward.

    x_nchw: (B, C, H, W).  Returns (B, H*W, H, W), matching the PyTorch module.
    out_dtype: dtype of the (B, S, S) result; default keeps x's dtype (f32
      parity).  bf16 halves the dominant HBM writeback if callers tolerate it.
    """
    B, C, H, W = x_nchw.shape
    S = H * W
    Ci = w_theta.shape[0]
    out_dtype = x_nchw.dtype if out_dtype is None else jnp.dtype(out_dtype)
    out_itemsize = jnp.dtype(out_dtype).itemsize

    vmem_cap = _vmem_capacity_bytes()
    # Keep the whole double-buffered working set well inside the per-core VMEM
    # of the present generation (v7x: 64 MiB; v5e/v6e: 128 MiB).
    vmem_budget = int(0.45 * min(vmem_cap, 128 << 20))
    TS = _choose_row_tile(S, C, Ci, out_itemsize, max(row_tile, 128), vmem_budget)
    num_tiles = S // TS

    # NCHW -> (B, C, NT, TS): pure reshape (no transpose, no copy); spatial
    # stays lane-major, split so the row-tile index is a sublane-side dim.
    x_tiled = x_nchw.reshape(B, C, num_tiles, TS)

    # 1x1 conv weights (Ci, C, 1, 1) -> (Ci, C); biases -> (Ci, 1).
    wt = w_theta.reshape(Ci, C)
    wp = w_phi.reshape(Ci, C)
    bt = b_theta.reshape(Ci, 1)
    bp = b_phi.reshape(Ci, 1)

    footprint = _per_step_vmem_bytes(TS, S, C, Ci, out_itemsize)
    vmem_limit = int(min(0.9 * vmem_cap,
                         max(32 << 20, 1.5 * footprint + (2 << 20))))

    cost = pl.CostEstimate(
        flops=B * (2 * Ci * S * S                      # pairwise (TS, S) products
                   + 2 * Ci * C * S * num_tiles        # theta, recomputed per row tile
                   + 2 * Ci * C * S),                  # phi, once per row tile
        transcendentals=0,
        bytes_accessed=(out_itemsize * B * S * S       # output writeback (dominant)
                        + 4 * B * C * S                # x read once per batch element
                        + 4 * (2 * Ci * C + 2 * Ci)),
    )

    out = pl.pallas_call(
        _nl_kernel,
        out_shape=jax.ShapeDtypeStruct((B, S, S), out_dtype),
        grid_spec=pltpu.PrefetchScalarGridSpec(
            num_scalar_prefetch=0,
            grid=(B, num_tiles),
            in_specs=[
                # Full-spatial x block: block index depends only on b, so it is
                # DMA'd from HBM once per batch element (no duplicate stream).
                pl.BlockSpec((1, C, num_tiles, TS), lambda b, j: (b, 0, 0, 0)),
                pl.BlockSpec((Ci, C), lambda b, j: (0, 0)),
                pl.BlockSpec((Ci, 1), lambda b, j: (0, 0)),
                pl.BlockSpec((Ci, C), lambda b, j: (0, 0)),
                pl.BlockSpec((Ci, 1), lambda b, j: (0, 0)),
            ],
            out_specs=pl.BlockSpec((1, TS, S), lambda b, j: (b, j, 0)),
        ),
        compiler_params=pltpu.CompilerParams(
            dimension_semantics=("parallel", "parallel"),
            vmem_limit_bytes=vmem_limit,
        ),
        cost_estimate=cost,
    )(x_tiled, wt, bt, wp, bp)

    # (B, S, S) -> (B, S, H, W): columns (theta spatial) become trailing H, W.
    return out.reshape(B, S, H, W)


def nl_block_reference(x_nchw, w_theta, b_theta, w_phi, b_phi):
    """Pure-JAX reference mirroring the PyTorch forward exactly."""
    B, C, H, W = x_nchw.shape
    Ci = w_theta.shape[0]
    wt = w_theta.reshape(Ci, C)
    wp = w_phi.reshape(Ci, C)
    x_flat = x_nchw.reshape(B, C, H * W)
    theta_x = jnp.einsum("ic,bcs->bis", wt, x_flat) + b_theta[None, :, None]
    phi_x = jnp.einsum("ic,bcs->bis", wp, x_flat) + b_phi[None, :, None]
    theta_x = jnp.transpose(theta_x, (0, 2, 1))          # (B, S, Ci)
    f = jnp.einsum("bsc,bct->bst", theta_x, phi_x)       # (B, S, S)
    y = jnp.transpose(f, (0, 2, 1))                      # permute(0, 2, 1)
    return y.reshape(B, -1, H, W)


if __name__ == "__main__":
    # Module config: NLBlockND(in_channels=4, mode='embedded', dimension=2)
    # -> inter_channels = 4 // 2 = 2.
    B, C, H, W = 2, 4, 16, 16
    Ci = C // 2

    key = jax.random.PRNGKey(0)
    k_x, k_wt, k_bt, k_wp, k_bp = jax.random.split(key, 5)

    x = jax.random.normal(k_x, (B, C, H, W), dtype=jnp.float32)

    # Deterministic synthetic parameters (shapes as in nn.Conv2d(C, Ci, k=1)).
    # g / W_z / bn params exist in __init__ but are unused by forward().
    w_theta = 0.1 * jax.random.normal(k_wt, (Ci, C, 1, 1), dtype=jnp.float32)
    b_theta = 0.1 * jax.random.normal(k_bt, (Ci,), dtype=jnp.float32)
    w_phi = 0.1 * jax.random.normal(k_wp, (Ci, C, 1, 1), dtype=jnp.float32)
    b_phi = 0.1 * jax.random.normal(k_bp, (Ci,), dtype=jnp.float32)

    y_ref = nl_block_reference(x, w_theta, b_theta, w_phi, b_phi)

    # f32 output, multi-tile path (row_tile=128 -> TS=128, 2 row tiles per batch
    # element, exercising the dynamic sublane tile index at a nonzero offset).
    y = nl_block_forward(x, w_theta, b_theta, w_phi, b_phi, row_tile=128)
    y = jax.block_until_ready(y)
    assert y.shape == (B, H * W, H, W), y.shape
    assert jnp.allclose(y, y_ref, atol=1e-4, rtol=1e-4), "f32 mismatch vs reference"

    # bf16 output (writeback-halving lever from the perf review); f32 accumulate.
    y_bf16 = nl_block_forward(x, w_theta, b_theta, w_phi, b_phi,
                              out_dtype=jnp.bfloat16)
    y_bf16 = jax.block_until_ready(y_bf16)
    assert jnp.allclose(y_bf16.astype(jnp.float32), y_ref, atol=2e-2, rtol=2e-2), \
        "bf16 mismatch vs reference"

    print("KERNEL_OK")
</pallas_src>

<mosaic_0001>
module attributes {stable_mosaic.version = 11 : i64} {
  func.func @_nl_kernel(%arg0: i32, %arg1: i32, %arg2: memref<1x4x2x128xf32, #tpu.memory_space<vmem>>, %arg3: memref<2x4xf32, #tpu.memory_space<vmem>>, %arg4: memref<2x1xf32, #tpu.memory_space<vmem>>, %arg5: memref<2x4xf32, #tpu.memory_space<vmem>>, %arg6: memref<2x1xf32, #tpu.memory_space<vmem>>, %arg7: memref<1x128x256xf32, #tpu.memory_space<vmem>>) attributes {dimension_semantics = [#tpu.dimension_semantics<parallel>, #tpu.dimension_semantics<parallel>], iteration_bounds = array<i64: 2, 2>, scalar_prefetch = 0 : i64, scratch_operands = 0 : i64, tpu.core_type = #tpu.core_type<tc>, window_params = [{transform_indices = @transform_0, window_bounds = array<i64: 1, 4, 2, 128>}, {pipeline_mode = #tpu.pipeline_mode<synchronous>, transform_indices = @transform_1, window_bounds = array<i64: 2, 4>}, {pipeline_mode = #tpu.pipeline_mode<synchronous>, transform_indices = @transform_2, window_bounds = array<i64: 2, 1>}, {pipeline_mode = #tpu.pipeline_mode<synchronous>, transform_indices = @transform_3, window_bounds = array<i64: 2, 4>}, {pipeline_mode = #tpu.pipeline_mode<synchronous>, transform_indices = @transform_4, window_bounds = array<i64: 2, 1>}, {transform_indices = @transform_5, window_bounds = array<i64: 1, 128, 256>}]} {
    %c0 = arith.constant 0 : index
    %c0_0 = arith.constant 0 : index
    %0 = vector.load %arg3[%c0, %c0_0] : memref<2x4xf32, #tpu.memory_space<vmem>>, vector<2x4xf32>
    %c0_1 = arith.constant 0 : index
    %c0_2 = arith.constant 0 : index
    %1 = vector.load %arg4[%c0_1, %c0_2] : memref<2x1xf32, #tpu.memory_space<vmem>>, vector<2x1xf32>
    %c0_3 = arith.constant 0 : index
    %c0_4 = arith.constant 0 : index
    %2 = vector.load %arg5[%c0_3, %c0_4] : memref<2x4xf32, #tpu.memory_space<vmem>>, vector<2x4xf32>
    %c0_5 = arith.constant 0 : index
    %c0_6 = arith.constant 0 : index
    %3 = vector.load %arg6[%c0_5, %c0_6] : memref<2x1xf32, #tpu.memory_space<vmem>>, vector<2x1xf32>
    %c0_7 = arith.constant 0 : index
    %c0_8 = arith.constant 0 : index
    %4 = arith.index_cast %arg1 : i32 to index
    %c0_9 = arith.constant 0 : index
    %5 = vector.load %arg2[%c0_7, %c0_8, %4, %c0_9] : memref<1x4x2x128xf32, #tpu.memory_space<vmem>>, vector<1x4x1x128xf32>
    %6 = vector.shape_cast %5 : vector<1x4x1x128xf32> to vector<4x128xf32>
    %cst = arith.constant dense<0.000000e+00> : vector<2x128xf32>
    %7 = tpu.matmul %2, %6, %cst {dimension_numbers = #tpu.dot_dimension_numbers<[1], [0], [0], [1], [0, 0, 1, 1], [], []>} : vector<2x4xf32>, vector<4x128xf32>, vector<2x128xf32> -> vector<2x128xf32>
    %8 = vector.broadcast %3 : vector<2x1xf32> to vector<2x128xf32>
    %9 = arith.addf %7, %8 : vector<2x128xf32>
    %c0_10 = arith.constant 0 : index
    %c0_11 = arith.constant 0 : index
    %c0_12 = arith.constant 0 : index
    %c0_13 = arith.constant 0 : index
    %10 = vector.load %arg2[%c0_10, %c0_11, %c0_12, %c0_13] : memref<1x4x2x128xf32, #tpu.memory_space<vmem>>, vector<1x4x1x128xf32>
    %11 = vector.shape_cast %10 : vector<1x4x1x128xf32> to vector<4x128xf32>
    %cst_14 = arith.constant dense<0.000000e+00> : vector<2x128xf32>
    %12 = tpu.matmul %0, %11, %cst_14 {dimension_numbers = #tpu.dot_dimension_numbers<[1], [0], [0], [1], [0, 0, 1, 1], [], []>} : vector<2x4xf32>, vector<4x128xf32>, vector<2x128xf32> -> vector<2x128xf32>
    %13 = vector.broadcast %1 : vector<2x1xf32> to vector<2x128xf32>
    %14 = arith.addf %12, %13 : vector<2x128xf32>
    %cst_15 = arith.constant dense<0.000000e+00> : vector<128x128xf32>
    %15 = tpu.matmul %9, %14, %cst_15 {dimension_numbers = #tpu.dot_dimension_numbers<[0], [0], [1], [1], [0, 1, 1, 1], [], []>} : vector<2x128xf32>, vector<2x128xf32>, vector<128x128xf32> -> vector<128x128xf32>
    %c0_16 = arith.constant 0 : index
    %c0_17 = arith.constant 0 : index
    %c0_18 = arith.constant 0 : index
    %16 = vector.load %arg7[%c0_16, %c0_17, %c0_18] : memref<1x128x256xf32, #tpu.memory_space<vmem>>, vector<1x128x128xf32>
    %17 = vector.shape_cast %16 : vector<1x128x128xf32> to vector<128x128xf32>
    %18 = vector.shape_cast %15 : vector<128x128xf32> to vector<1x128x128xf32>
    tpu.vector_store %arg7[%c0_16, %c0_17, %c0_18], %18 {strides = array<i32>} : memref<1x128x256xf32, #tpu.memory_space<vmem>>, vector<1x128x128xf32>,
    %c0_19 = arith.constant 0 : index
    %c0_20 = arith.constant 0 : index
    %c1 = arith.constant 1 : index
    %c0_21 = arith.constant 0 : index
    %19 = vector.load %arg2[%c0_19, %c0_20, %c1, %c0_21] : memref<1x4x2x128xf32, #tpu.memory_space<vmem>>, vector<1x4x1x128xf32>
    %20 = vector.shape_cast %19 : vector<1x4x1x128xf32> to vector<4x128xf32>
    %cst_22 = arith.constant dense<0.000000e+00> : vector<2x128xf32>
    %21 = tpu.matmul %0, %20, %cst_22 {dimension_numbers = #tpu.dot_dimension_numbers<[1], [0], [0], [1], [0, 0, 1, 1], [], []>} : vector<2x4xf32>, vector<4x128xf32>, vector<2x128xf32> -> vector<2x128xf32>
    %22 = vector.broadcast %1 : vector<2x1xf32> to vector<2x128xf32>
    %23 = arith.addf %21, %22 : vector<2x128xf32>
    %cst_23 = arith.constant dense<0.000000e+00> : vector<128x128xf32>
    %24 = tpu.matmul %9, %23, %cst_23 {dimension_numbers = #tpu.dot_dimension_numbers<[0], [0], [1], [1], [0, 1, 1, 1], [], []>} : vector<2x128xf32>, vector<2x128xf32>, vector<128x128xf32> -> vector<128x128xf32>
    %c0_24 = arith.constant 0 : index
    %c0_25 = arith.constant 0 : index
    %c128 = arith.constant 128 : index
    %25 = vector.load %arg7[%c0_24, %c0_25, %c128] : memref<1x128x256xf32, #tpu.memory_space<vmem>>, vector<1x128x128xf32>
    %26 = vector.shape_cast %25 : vector<1x128x128xf32> to vector<128x128xf32>
    %27 = vector.shape_cast %24 : vector<128x128xf32> to vector<1x128x128xf32>
    tpu.vector_store %arg7[%c0_24, %c0_25, %c128], %27 {strides = array<i32>} : memref<1x128x256xf32, #tpu.memory_space<vmem>>, vector<1x128x128xf32>,
    return
  }
  func.func @transform_0(%arg0: i32, %arg1: i32) -> (i32, i32, i32, i32) {
    %c0_i32 = arith.constant 0 : i32
    %c0_i32_0 = arith.constant 0 : i32
    %c0_i32_1 = arith.constant 0 : i32
    %c0_i32_2 = arith.constant 0 : i32
    return %arg0, %c0_i32, %c0_i32_0, %c0_i32_1 : i32, i32, i32, i32
  }
  func.func @transform_1(%arg0: i32, %arg1: i32) -> (i32, i32) {
    %c0_i32 = arith.constant 0 : i32
    %c0_i32_0 = arith.constant 0 : i32
    %c0_i32_1 = arith.constant 0 : i32
    return %c0_i32, %c0_i32_0 : i32, i32
  }
  func.func @transform_2(%arg0: i32, %arg1: i32) -> (i32, i32) {
    %c0_i32 = arith.constant 0 : i32
    %c0_i32_0 = arith.constant 0 : i32
    %c0_i32_1 = arith.constant 0 : i32
    return %c0_i32, %c0_i32_0 : i32, i32
  }
  func.func @transform_3(%arg0: i32, %arg1: i32) -> (i32, i32) {
    %c0_i32 = arith.constant 0 : i32
    %c0_i32_0 = arith.constant 0 : i32
    %c0_i32_1 = arith.constant 0 : i32
    return %c0_i32, %c0_i32_0 : i32, i32
  }
  func.func @transform_4(%arg0: i32, %arg1: i32) -> (i32, i32) {
    %c0_i32 = arith.constant 0 : i32
    %c0_i32_0 = arith.constant 0 : i32
    %c0_i32_1 = arith.constant 0 : i32
    return %c0_i32, %c0_i32_0 : i32, i32
  }
  func.func @transform_5(%arg0: i32, %arg1: i32) -> (i32, i32, i32) {
    %c0_i32 = arith.constant 0 : i32
    %c0_i32_0 = arith.constant 0 : i32
    return %arg0, %arg1, %c0_i32 : i32, i32, i32
  }
}

</mosaic_0001>

<bundles_post_ra>
// kernel: tpu_custom_call.1
= control target key start
LH: loop header
LB: loop body
LE: loop exit
PB: predicated region body
PF: predicated region fallthrough
CT: control target
= control target key end

     0   :  { %10 = vsyncpa [#allocation3], 0  ;;  %s1861_s0 = inlined_call_operand.hbm [shape: f32[2,4,2,128], index: 0, kind: input, shape index: {}]   ;;  %s1862_s1 = inlined_call_operand.vmem [shape: f32[2,4], index: 1, kind: input, shape index: {}]   ;;  %s1863_s2 = inlined_call_operand.vmem [shape: f32[2,1], index: 2, kind: input, shape index: {}]   ;;  %s1864_s3 = inlined_call_operand.vmem [shape: f32[2,4], index: 3, kind: input, shape index: {}]   ;;  %s1865_s4 = inlined_call_operand.vmem [shape: f32[2,1], index: 4, kind: input, shape index: {}]   ;;  %s1866_s5 = inlined_call_operand.hbm [shape: f32[2,256,256], index: 5, kind: output, shape index: {}]  }
   0x1   :  { %12 = vsyncpa [#allocation3 + $0x1], 0 }
   0x2   :  { %13 = vsyncpa [#allocation4], 0 }
   0x3   :  { %15 = vsyncpa [#allocation4 + $0x1], 0  ;;  %s1526_s18 = smov 0   ;;  %s1528_s19 = smov 0  }
   0x4   :  { %s1530_s20 = smov 0   ;;  %s1532_s21 = smov 0  }
   0x5   :  { %s1534_s22 = smov 0   ;;  %s1536_s23 = smov 0  }
   0x6   :  { %s1538_s24 = smov 0   ;;  %s1540_s25 = smov 0  }
   0x7   :  { %s1542_s26 = smov 0   ;;  %s1544_s27 = smov 0  }
   0x8   :  { %s1546_s28 = smov 0  }
   0x9 LB: > { %1871 = sst [smem:[#allocation8_spill]] %s1481_s27  ;;  %s1057_s29 = sadd.s32 4294967295, %s1485_s28   ;;  %s1485_s28 = sphi %s1546_s28, %s21_s28   ;;  %s1481_s27 = sphi %s1544_s27, %s1884_s27   ;;  %s1477_s26 = sphi %s1542_s26, %s1892_s26   ;;  %s1473_s25 = sphi %s1540_s25, %s1882_s25   ;;  %s1469_s24 = sphi %s1538_s24, %s1891_s24   ;;  %s1465_s23 = sphi %s1536_s23, %s1890_s23   ;;  %s1461_s22 = sphi %s1534_s22, %s1889_s22   ;;  %s1457_s21 = sphi %s1532_s21, %s1888_s21   ;;  %s1453_s20 = sphi %s1530_s20, %s1887_s20   ;;  %s1449_s19 = sphi %s1528_s19, %s1886_s19   ;;  %s1445_s18 = sphi %s1526_s18, %s1885_s18  }
   0xa   : > { %s1058_s30 = sadd.s32 4294967294, %s1485_s28   ;;  %s30_s6 = sadd.s32 1, %s1477_s26 }
   0xb   : > { %s33_s7 = sadd.s32 1, %s1481_s27  ;;  %p31_p0 = scmp.ge.s32.totalorder %s30_s6, 2 }
   0xc   : > { %s40_s8 = sadd.s32 1, %s1465_s23  ;;  %p47_p1 = scmp.ne.s32.totalorder %s1465_s23, %s1461_s22 }
   0xd   : > { %p48_p2 = scmp.eq.s32.totalorder %s1485_s28, 0  ;;  %s1894_s6 = smov (%p31_p0, %s30_s6), 0 }
   0xe   : > { %1872 = sst [smem:[#allocation9_spill]] %s1894_s6  ;;  %s1896_s7 = smov (!%p31_p0, %s33_s7), %s1481_s27 }
   0xf   : > { %p1590_p3 = por %p48_p2, %p47_p1  ;;  %p53_p4 = scmp.ne.s32.totalorder %s1461_s22, %s1457_s21 }
  0x10   : > { %p35_p5 = scmp.ge.s32.totalorder %s1896_s7, 2  ;;  %p54_p6 = scmp.eq.s32.totalorder %s1057_s29, 0 }
  0x11   : > { %s148_s10 = ssub.s32 %s1477_s26, %s1894_s6  ;;  %s152_s11 = sadd.s32 1, %s1453_s20 }
  0x12   : > { %s1898_s7 = smov (%p35_p5, %s1896_s7), 0  ;;  %p1600_p7 = por %p54_p6, %p53_p4 }
  0x13   : > { %1874 = sst [smem:[#allocation10_spill]] %s1898_s7  ;;  %p162_p8 = scmp.ne.s32.totalorder %s1453_s20, %s1449_s19 }
  0x14   : > { %s37_s13 = ssub.s32 %s1481_s27, %s1898_s7  ;;  %p163_p9 = scmp.eq.s32.totalorder %s1057_s29, 3 }
  0x15   : > { %p38_p10 = scmp.eq.s32.totalorder %s37_s13, 0  ;;  %s149_s14 = sor.u32 %s148_s10, %s37_s13 }
  0x16   : > { %p150_p11 = scmp.eq.s32.totalorder %s149_s14, 0  ;;  %p1608_p12 = por %p163_p9, %p162_p8 }
  0x17   : > { %s1613_s16 = scalar_select %p38_p10, %s1465_s23, %s40_s8  }
  0x18   : > { %s1876_s15 = scalar_select %p1608_p12, 1, 0 }
  0x19   : > { %s1616_s17 = scalar_select %p150_p11, %s1453_s20, %s152_s11  }
  0x1a   : > { %p168_p13 = scmp.ne.s32.totalorder %s1449_s19, %s1445_s18  ;;  %p169_p0 = scmp.eq.s32.totalorder %s1058_s30, 3 }
  0x1b   : > { %p1235_p1 = scmp.lt.s32.totalorder %s1485_s28, 4  ;;  %s201_s29 = sand.u32 1, %s1465_s23  }
  0x1c   : > { %p1621_p2 = por %p169_p0, %p168_p13  ;;  %s1061_s10 = sshll.u32 %s201_s29, 3 }
  0x1d   : > { %s1114_s13 = sshll.u32 %s1481_s27, 7  ;;  %s205_s8 = scalar_lea.vmem [#allocation2], %s1061_s10 }
  0x1e   : > { %s1877_s21 = scalar_select %p1621_p2, 1, 0 }
  0x1f   : > { %s1630_s6 = scalar_lea.hbm %s1861_s0, %s1114_s13  ;;  %s212_s11 = sshll.u32 %s205_s8, 4  ;;  %s1632_s11 = int_to_ptr.vmem [resolvable:$true] %s212_s11 }
  0x20   : > { %p1636_p4 = pnand %p1235_p1, %p1590_p3  ;;  %s1641_s27 = scalar_lea.sflag [#allocation3], %s201_s29 }
  0x21   : > { %s1333_s7 = scalar_lea.hbm %s1630_s6, 128  ;;  %s1338_s9 = scalar_lea.hbm %s1861_s0, 256 }
  0x22   : > { %p1334_p6 = scmp.ne.s32.totalorder %s1630_s6, %s1333_s7  ;;  %p1335_p8 = pneg %p1636_p4 }
  0x23   : > { %p1339_p3 = scmp.lt.u32.totalorder %s1630_s6, %s1861_s0  ;;  %p1340_p11 = scmp.lt.u32.totalorder %s1338_s9, %s1333_s7 }
  0x24   : > { %p1336_p9 = pnand %p1335_p8, %p1334_p6  ;;  %p1342_p0 = scmp.lt.u32.totalorder %s1333_s7, %s1630_s6 }
  0x25   : > { %p1341_p13 = por %p1340_p11, %p1339_p3 }
  0x26   : > { %p1337_p10 = pneg %p1336_p9 }
  0x27   : > { %p1343_p1 = por %p1342_p0, %p1341_p13 }
  0x29   : > { %p1344_p5 = pnand %p1343_p1, %p1337_p10 }
  0x2b   : > { %1347 = shalt.err (!%p1344_p5)
}
  0x2c   : > { %s1348_s29 = scalar_lea.vmem %s1632_s11, 128  ;;  %s1487_s10 = smov [#allocation2]  }
  0x2d   : > { %p1349_p6 = scmp.ne.s32.totalorder %s1632_s11, %s1348_s29  ;;  %s1353_s13 = sshll.u32 %s1487_s10, 4  ;;  %s1354_s13 = int_to_ptr.vmem [resolvable:$false] %s1353_s13 }
  0x2e   : > { %s1355_s14 = scalar_lea.vmem %s1354_s13, 256  ;;  %p1356_p12 = scmp.lt.s32.totalorder %s1632_s11, %s1354_s13 }
  0x2f   : > { %p1351_p9 = pnand %p1349_p6, %p1335_p8  ;;  %p1357_p3 = scmp.lt.s32.totalorder %s1355_s14, %s1348_s29 }
  0x31   : > { %p1352_p2 = pneg %p1351_p9  ;;  %p1358_p11 = por %p1357_p3, %p1356_p12 }
  0x33   : > { %p1359_p13 = pnand %p1358_p11, %p1352_p2 }
  0x35   : > { %1362 = shalt.err (!%p1359_p13)
}
  0x36   : > { %s1488_s7 = smov 32   ;;  %s1489_s9 = smov 2  }
  0x37   : > { %1230 = dma.hbm_to_vmem [thread:$0]  (!%p1636_p4), %s1630_s6, 128, %s1632_s11, %s1641_s27, %s1488_s7, %s1488_s7, %s1489_s9  }
  0x38   : > { %p220_p5 = scmp.lt.s32.totalorder %s1485_s28, 5  ;;  %p1879_p8 = scmp.ge.s32.totalorder %s1485_s28, 1 }
  0x3a   : > { %p221_p10 = pnand %p1879_p8, %p220_p5 }
  0x3b   : > { %s226_s8 = sand.u32 (!%p221_p10), 1, %s1461_s22  }
  0x3c   : > { %224 = sbr.rel (%p221_p10) target bundleno = 707 (0x2c3), region = 40  ;;  %s1065_s29 = sshll.u32 (!%p221_p10), %s226_s8, 3 }
  0x3d   : > { %s227_s10 = scalar_lea.sflag (!%p221_p10), [#allocation3], %s226_s8  ;;  %s1673_s13 = scalar_lea.vmem (!%p221_p10), [#allocation2], %s1065_s29 }
  0x43   : > { %1436 = dma.done.wait (%p1600_p7), %s227_s10, 128  }
  0x44   : > { %1438 = vsyncadd (%p1600_p7), %s227_s10, 4294967168  ;;  %v1490_v0 = vmov 0.0   ;;  %vm1491_vm0 = vmmov 0   ;;  %v1492_v1 = vmov 0   ;;  %s262_s27 = scalar_lea.vmem %s1673_s13, %s1469_s24 [#allocation2]  ;;  %vm277_vm1 = vcmask 1041409   ;;  %s254_s29 = sand.u32 1, %s1449_s19  }
  0x45   : > { %1156 = vmatprep.subr.mxu0 %v1490_v0  ;;  %1161 = vmatprep.subr.mxu1 %v1490_v0  ;;  %vm280_vm2 = vcmask 1042434   ;;  %vm283_vm3 = vcmask 1043459   ;;  %v263_v2 = vld [vmem:[%s262_s27] sm:$0x1]  ;;  %v264_v3 = vld [vmem:[%s262_s27 + $0x2] sm:$0x1] }
  0x46   : > { %1158 = vmatprep.mubr.msk.f32.mxu0 %vm1491_vm0, %v1490_v0  ;;  %1163 = vmatprep.mubr.msk.f32.mxu1 %vm1491_vm0, %v1490_v0  ;;  %v265_v4 = vld [vmem:[%s262_s27 + $0x4] sm:$0x1]  ;;  %v266_v5 = vld [vmem:[%s262_s27 + $0x6] sm:$0x1]  ;;  %v276_v6 = vrot.slane %v264_v3, 7  ;;  %vm289_vm4 = vcmask 1043456  }
  0x47   : > { %1332 = vset.pattern.permute.xlu0 %v1492_v1  ;;  %v279_v7 = vrot.slane %v265_v4, 6  ;;  %v362_v8 = vld [vmem:[%s1673_s13] sm:$0x1]  ;;  %v282_v9 = vrot.slane %v266_v5, 5  ;;  %v363_v10 = vld [vmem:[%s1673_s13 + $0x2] sm:$0x1] }
  0x48   : > { %v364_v11 = vld [vmem:[%s1673_s13 + $0x4] sm:$0x1]  ;;  %v278_v12 = vsel %vm277_vm1, %v276_v6, %v263_v2  ;;  %v365_v13 = vld [vmem:[%s1673_s13 + $0x6] sm:$0x1]  ;;  %v375_v14 = vrot.slane %v363_v10, 7  ;;  %vm285_vm5 = vcmask 31744  }
  0x49   : > { %v377_v15 = vrot.slane %v364_v11, 6  ;;  %v260_v16 = vld [vmem:[%s1864_s3] sm:$0x3]  ;;  %v281_v17 = vsel %vm280_vm2, %v279_v7, %v278_v12  ;;  %v379_v18 = vrot.slane %v365_v13, 5  ;;  %v703_v23 = vld [vmem:[%s1673_s13 + $0x3] sm:$0x1] }
  0x4a   : > { %v258_v19 = vld [vmem:[%s1862_s1] sm:$0x3]  ;;  %v284_v21 = vsel %vm283_vm3, %v282_v9, %v281_v17  ;;  %v376_v22 = vsel %vm277_vm1, %v375_v14, %v362_v8  ;;  %v704_v24 = vld [vmem:[%s1673_s13 + $0x5] sm:$0x1]  ;;  %v705_v25 = vld [vmem:[%s1673_s13 + $0x7] sm:$0x1] }
  0x4b   : > { %v702_v20 = vld [vmem:[%s1673_s13 + $0x1] sm:$0x1]  ;;  %1157 = vmatpush3.msk.msra.mxu0 %vm289_vm4, %v284_v21  ;;  %v378_v26 = vsel %vm280_vm2, %v377_v15, %v376_v22  ;;  %v710_v27 = vrot.slane %v703_v23, 7  ;;  %v712_v28 = vrot.slane %v704_v24, 6  ;;  %v714_v29 = vrot.slane %v705_v25, 5  ;;  %s1066_s10 = sshll.u32 %s254_s29, 8 }
  0x4c   : > { %v261_v30 = vld [vmem:[%s1865_s4] sm:$0x3]  ;;  %v380_v31 = vsel %vm283_vm3, %v379_v18, %v378_v26  ;;  %1159 = vmatmul.mubr.msk.f32.vlgmr.msra.gmra.mrb[0].mxu0 %vm285_vm5, %v260_v16  ;;  %vm537_vm6 = vcmask 1041408   ;;  %vm488_vm7 = vcmask 15360   ;;  %s1754_s13 = scalar_lea.vmem [#allocation5], %s1066_s10  ;;  %s1115_s27 = sshll.u32 %s1469_s24, 5 }
  0x4d   : > { %269 = vperm.xlu0 %1332, %v261_v30   ;;  %1162 = vmatpush3.msk.msra.mxu1 %vm289_vm4, %v380_v31  ;;  %v711_v32 = vsel %vm277_vm1, %v710_v27, %v702_v20  ;;  %v259_v33 = vld [vmem:[%s1863_s2] sm:$0x3]  ;;  %s1110_s6 = sshll.u32 %s1473_s25, 6  ;;  %s969_s30 = sshll.u32 %s1754_s13, 4  ;;  %s1792_s30 = int_to_ptr.vmem [resolvable:$true] %s969_s30 }
  0x4e   : > { %1164 = vmatmul.mubr.msk.f32.vlgmr.msra.gmra.mrb[0].mxu1 %vm285_vm5, %v258_v19  ;;  %1192 = vmatprep.subr.mxu1 %v1490_v0  ;;  %v713_v34 = vsel %vm280_vm2, %v712_v28, %v711_v32  ;;  %s966_s12 = sadd.s32 %s1115_s27, %s1110_s6  ;;  %s1800_s7 = scalar_lea.sflag [#allocation4], %s254_s29 }
  0x4f   : > { %v715_v35 = vsel %vm283_vm3, %v714_v29, %v713_v34  ;;  %1194 = vmatprep.mubr.msk.f32.mxu1 %vm1491_vm0, %v1490_v0  ;;  %s1111_s11 = sshll.u32 %s966_s12, 7  ;;  %s1363_s9 = scalar_lea.vmem %s1792_s30, 4096 }
  0x50   : > { %1193 = vmatpush3.msk.msra.mxu1 %vm289_vm4, %v715_v35  ;;  %s1790_s25 = scalar_lea.hbm %s1866_s5, %s1111_s11  ;;  %p1364_p7 = scmp.ne.s32.totalorder %s1792_s30, %s1363_s9 }
  0x51   : > { %368 = vperm.xlu0 %1332, %v259_v33   ;;  %p1880_p12 = scmp.ne.s32.totalorder %s1876_s15, 0  ;;  %s1493_s8 = smov [#allocation5]  }
  0x52   : > { %1195 = vmatmul.mubr.msk.f32.vlgmr.msra.gmra.mrb[2].mxu1 %vm285_vm5, %v258_v19  ;;  %s1367_s10 = sshll.u32 %s1493_s8, 4  ;;  %s1368_s10 = int_to_ptr.vmem [resolvable:$false] %s1367_s10 }
  0x53   : > { %p1365_p2 = pnand %p1364_p7, %p1880_p12  ;;  %s1369_s27 = scalar_lea.vmem %s1368_s10, 8192 }
  0x54   : > { %p1370_p0 = scmp.lt.s32.totalorder %s1792_s30, %s1368_s10  ;;  %p1371_p1 = scmp.lt.s32.totalorder %s1369_s27, %s1363_s9 }
  0x55   : > { %p1366_p4 = pneg %p1365_p2 }
  0x56   : > { %p1372_p6 = por %p1371_p1, %p1370_p0 }
  0x58   : > { %p1373_p9 = pnand %p1372_p6, %p1366_p4 }
  0xcc   : > { %v270_v36 = vpop.permute.xlu0 %269 }
  0xd0   : > { %v369_v38 = vpop.permute.xlu0 %368 }
 0x11f   : > { %v358_v37 = vpop.f32.mrb[0].mxu0 }
 0x120   : > { %v1160_v39 = vpop.f32.mrb[1].mxu0  ;;  %v359_v40 = vadd.f32 %v358_v37, %v270_v36 }
 0x121   : > { %v452_v41 = vpop.f32.mrb[0].mxu1 }
 0x122   : > { %v453_v42 = vadd.f32 %v452_v41, %v369_v38  ;;  %456 = vxpose.xlu1.b32.start.end [1/1] (short) %v359_v40, 128  ;;  %v1165_v43 = vpop.f32.mrb[1].mxu1 }
 0x124   : > { %1166 = vmatprep.subr.msk.mxu0 %vm537_vm6, %v453_v42 }
 0x125   : > { %1167 = vmatpush3.msk.msra.mxu0 %vm537_vm6, %v453_v42  ;;  %v784_v44 = vpop.f32.mrb[2].mxu1 }
 0x126   : > { %v785_v45 = vadd.f32 %v784_v44, %v369_v38  ;;  %v1196_v46 = vpop.f32.mrb[3].mxu1 }
 0x128   : > { %1197 = vmatprep.subr.msk.mxu1 %vm537_vm6, %v785_v45 }
 0x129   : > { %1198 = vmatpush3.msk.msra.mxu1 %vm537_vm6, %v785_v45 }
 0x1a2   : > { %v472_v47 = vpop.trf.xlu1 }
 0x1a3   : > { %1168 = vmatprep.mubr.msk.f32.mxu0 %vm488_vm7, %v472_v47  ;;  %1199 = vmatprep.mubr.msk.f32.mxu1 %vm488_vm7, %v472_v47 }
 0x1a6   : > { %v473_v48 = vpop.trf.xlu1 }
 0x1a7   : > { %1169 = vmatmul.mubr.msk.f32.vlgmr.msra.gmra.mrb[2].mxu0 %vm488_vm7, %v473_v48  ;;  %1200 = vmatmul.mubr.msk.f32.vlgmr.msra.gmra.mrb[4].mxu1 %vm488_vm7, %v473_v48 }
 0x1aa   : > { %v474_v49 = vpop.trf.xlu1 }
 0x1ab   : > { %1171 = vmatprep.mubr.msk.f32.mxu0 %vm488_vm7, %v474_v49  ;;  %1202 = vmatprep.mubr.msk.f32.mxu1 %vm488_vm7, %v474_v49 }
 0x1ae   : > { %v475_v50 = vpop.trf.xlu1 }
 0x1af   : > { %1172 = vmatmul.mubr.msk.f32.gmra.mrb[4].mxu0 %vm488_vm7, %v475_v50  ;;  %1203 = vmatmul.mubr.msk.f32.gmra.mrb[6].mxu1 %vm488_vm7, %v475_v50 }
 0x1b2   : > { %v476_v51 = vpop.trf.xlu1 }
 0x1b3   : > { %1174 = vmatprep.mubr.msk.f32.mxu0 %vm488_vm7, %v476_v51  ;;  %1205 = vmatprep.mubr.msk.f32.mxu1 %vm488_vm7, %v476_v51 }
 0x1b6   : > { %v477_v52 = vpop.trf.xlu1 }
 0x1b7   : > { %1175 = vmatmul.mubr.msk.f32.gmra.mrb[6].mxu0 %vm488_vm7, %v477_v52  ;;  %1206 = vmatmul.mubr.msk.f32.gmra.mrb[8].mxu1 %vm488_vm7, %v477_v52 }
 0x1ba   : > { %v478_v53 = vpop.trf.xlu1 }
 0x1bb   : > { %1177 = vmatprep.mubr.msk.f32.mxu0 %vm488_vm7, %v478_v53  ;;  %1208 = vmatprep.mubr.msk.f32.mxu1 %vm488_vm7, %v478_v53 }
 0x1be   : > { %v479_v54 = vpop.trf.xlu1 }
 0x1bf   : > { %1178 = vmatmul.mubr.msk.f32.gmra.mrb[8].mxu0 %vm488_vm7, %v479_v54  ;;  %1209 = vmatmul.mubr.msk.f32.gmra.mrb[10].mxu1 %vm488_vm7, %v479_v54 }
 0x1c2   : > { %v480_v55 = vpop.trf.xlu1 }
 0x1c3   : > { %1180 = vmatprep.mubr.msk.f32.mxu0 %vm488_vm7, %v480_v55  ;;  %1211 = vmatprep.mubr.msk.f32.mxu1 %vm488_vm7, %v480_v55 }
 0x1c6   : > { %v481_v56 = vpop.trf.xlu1 }
 0x1c7   : > { %1181 = vmatmul.mubr.msk.f32.gmra.mrb[10].mxu0 %vm488_vm7, %v481_v56  ;;  %1212 = vmatmul.mubr.msk.f32.gmra.mrb[12].mxu1 %vm488_vm7, %v481_v56 }
 0x1ca   : > { %v482_v57 = vpop.trf.xlu1 }
 0x1cb   : > { %1183 = vmatprep.mubr.msk.f32.mxu0 %vm488_vm7, %v482_v57  ;;  %1214 = vmatprep.mubr.msk.f32.mxu1 %vm488_vm7, %v482_v57 }
 0x1ce   : > { %v483_v58 = vpop.trf.xlu1 }
 0x1cf   : > { %1184 = vmatmul.mubr.msk.f32.gmra.mrb[12].mxu0 %vm488_vm7, %v483_v58  ;;  %1215 = vmatmul.mubr.msk.f32.gmra.mrb[14].mxu1 %vm488_vm7, %v483_v58 }
 0x1d2   : > { %v484_v59 = vpop.trf.xlu1 }
 0x1d3   : > { %1186 = vmatprep.mubr.msk.f32.mxu0 %vm488_vm7, %v484_v59  ;;  %1217 = vmatprep.mubr.msk.f32.mxu1 %vm488_vm7, %v484_v59 }
 0x1d6   : > { %v485_v60 = vpop.trf.xlu1 }
 0x1d7   : > { %1187 = vmatmul.mubr.msk.f32.gmra.mrb[14].mxu0 %vm488_vm7, %v485_v60  ;;  %1218 = vmatmul.mubr.msk.f32.gmra.mrb[16].mxu1 %vm488_vm7, %v485_v60 }
 0x1da   : > { %v486_v61 = vpop.trf.xlu1 }
 0x1db   : > { %1189 = vmatprep.mubr.msk.f32.mxu0 %vm488_vm7, %v486_v61  ;;  %1220 = vmatprep.mubr.msk.f32.mxu1 %vm488_vm7, %v486_v61 }
 0x1de   : > { %v487_v62 = vpop.trf.xlu1 }
 0x1df   : > { %1190 = vmatmul.mubr.msk.f32.gmra.mrb[16].mxu0 %vm488_vm7, %v487_v62  ;;  %1221 = vmatmul.mubr.msk.f32.gmra.mrb[18].mxu1 %vm488_vm7, %v487_v62 }
 0x27a   : > { %v1170_v63 = vpop.f32.mrb[2].mxu0  ;;  %v1201_v0 = vpop.f32.mrb[4].mxu1 }
 0x27b   : > { %687 = vst [vmem:[%s1754_s13 + $0x10] sm:$0xff] %v1170_v63  ;;  %937 = vst [vmem:[%s1754_s13 + $0x18] sm:$0xff] %v1201_v0  ;;  %v607_v1 = vpop.f32.mrb[3].mxu0  ;;  %v857_v2 = vpop.f32.mrb[5].mxu1 }
 0x27c   : > { %686 = vst [vmem:[%s1754_s13] sm:$0xff] %v607_v1  ;;  %936 = vst [vmem:[%s1754_s13 + $0x8] sm:$0xff] %v857_v2 }
 0x282   : > { %v1173_v3 = vpop.f32.mrb[4].mxu0  ;;  %v1204_v4 = vpop.f32.mrb[6].mxu1 }
 0x283   : > { %689 = vst [vmem:[%s1754_s13 + $0x30] sm:$0xff] %v1173_v3  ;;  %939 = vst [vmem:[%s1754_s13 + $0x38] sm:$0xff] %v1204_v4  ;;  %v617_v5 = vpop.f32.mrb[5].mxu0  ;;  %v867_v6 = vpop.f32.mrb[7].mxu1 }
 0x284   : > { %688 = vst [vmem:[%s1754_s13 + $0x20] sm:$0xff] %v617_v5  ;;  %938 = vst [vmem:[%s1754_s13 + $0x28] sm:$0xff] %v867_v6 }
 0x28a   : > { %v1176_v7 = vpop.f32.mrb[6].mxu0  ;;  %v1207_v8 = vpop.f32.mrb[8].mxu1 }
 0x28b   : > { %691 = vst [vmem:[%s1754_s13 + $0x50] sm:$0xff] %v1176_v7  ;;  %941 = vst [vmem:[%s1754_s13 + $0x58] sm:$0xff] %v1207_v8  ;;  %v627_v9 = vpop.f32.mrb[7].mxu0  ;;  %v877_v10 = vpop.f32.mrb[9].mxu1 }
 0x28c   : > { %690 = vst [vmem:[%s1754_s13 + $0x40] sm:$0xff] %v627_v9  ;;  %940 = vst [vmem:[%s1754_s13 + $0x48] sm:$0xff] %v877_v10 }
 0x292   : > { %v1179_v11 = vpop.f32.mrb[8].mxu0  ;;  %v1210_v12 = vpop.f32.mrb[10].mxu1 }
 0x293   : > { %693 = vst [vmem:[%s1754_s13 + $0x70] sm:$0xff] %v1179_v11  ;;  %943 = vst [vmem:[%s1754_s13 + $0x78] sm:$0xff] %v1210_v12  ;;  %v637_v13 = vpop.f32.mrb[9].mxu0  ;;  %v887_v14 = vpop.f32.mrb[11].mxu1 }
 0x294   : > { %692 = vst [vmem:[%s1754_s13 + $0x60] sm:$0xff] %v637_v13  ;;  %942 = vst [vmem:[%s1754_s13 + $0x68] sm:$0xff] %v887_v14 }
 0x29a   : > { %v1182_v15 = vpop.f32.mrb[10].mxu0  ;;  %v1213_v16 = vpop.f32.mrb[12].mxu1 }
 0x29b   : > { %695 = vst [vmem:[%s1754_s13 + $0x90] sm:$0xff] %v1182_v15  ;;  %945 = vst [vmem:[%s1754_s13 + $0x98] sm:$0xff] %v1213_v16  ;;  %v647_v17 = vpop.f32.mrb[11].mxu0  ;;  %v897_v18 = vpop.f32.mrb[13].mxu1 }
 0x29c   : > { %694 = vst [vmem:[%s1754_s13 + $0x80] sm:$0xff] %v647_v17  ;;  %944 = vst [vmem:[%s1754_s13 + $0x88] sm:$0xff] %v897_v18 }
 0x2a2   : > { %v1185_v19 = vpop.f32.mrb[12].mxu0  ;;  %v1216_v20 = vpop.f32.mrb[14].mxu1 }
 0x2a3   : > { %697 = vst [vmem:[%s1754_s13 + $0xb0] sm:$0xff] %v1185_v19  ;;  %947 = vst [vmem:[%s1754_s13 + $0xb8] sm:$0xff] %v1216_v20  ;;  %v657_v21 = vpop.f32.mrb[13].mxu0  ;;  %v907_v22 = vpop.f32.mrb[15].mxu1 }
 0x2a4   : > { %696 = vst [vmem:[%s1754_s13 + $0xa0] sm:$0xff] %v657_v21  ;;  %946 = vst [vmem:[%s1754_s13 + $0xa8] sm:$0xff] %v907_v22 }
 0x2aa   : > { %v1188_v23 = vpop.f32.mrb[14].mxu0  ;;  %v1219_v24 = vpop.f32.mrb[16].mxu1 }
 0x2ab   : > { %699 = vst [vmem:[%s1754_s13 + $0xd0] sm:$0xff] %v1188_v23  ;;  %949 = vst [vmem:[%s1754_s13 + $0xd8] sm:$0xff] %v1219_v24  ;;  %v667_v25 = vpop.f32.mrb[15].mxu0  ;;  %v917_v26 = vpop.f32.mrb[17].mxu1 }
 0x2ac   : > { %698 = vst [vmem:[%s1754_s13 + $0xc0] sm:$0xff] %v667_v25  ;;  %948 = vst [vmem:[%s1754_s13 + $0xc8] sm:$0xff] %v917_v26 }
 0x2b2   : > { %v1191_v27 = vpop.f32.mrb[16].mxu0  ;;  %v1222_v28 = vpop.f32.mrb[18].mxu1 }
 0x2b3   : > { %701 = vst [vmem:[%s1754_s13 + $0xf0] sm:$0xff] %v1191_v27  ;;  %951 = vst [vmem:[%s1754_s13 + $0xf8] sm:$0xff] %v1222_v28  ;;  %v677_v29 = vpop.f32.mrb[17].mxu0  ;;  %v927_v30 = vpop.f32.mrb[19].mxu1 }
 0x2b4   : > { %700 = vst [vmem:[%s1754_s13 + $0xe0] sm:$0xff] %v677_v29  ;;  %950 = vst [vmem:[%s1754_s13 + $0xe8] sm:$0xff] %v927_v30 }
 0x2b5   : > { %1376 = shalt.err (!%p1373_p9)
}
 0x2b6   : > { %s1377_s29 = scalar_lea.hbm %s1790_s25, 4096  ;;  %s1381_s12 = scalar_lea.hbm %s1866_s5, 16384 }
 0x2b7   : > { %p1378_p3 = scmp.ne.s32.totalorder %s1790_s25, %s1377_s29  ;;  %p1382_p5 = scmp.lt.u32.totalorder %s1790_s25, %s1866_s5 }
 0x2b8   : > { %p1383_p8 = scmp.lt.u32.totalorder %s1381_s12, %s1377_s29  ;;  %p1385_p7 = scmp.lt.u32.totalorder %s1377_s29, %s1790_s25 }
 0x2b9   : > { %p1379_p11 = pnand %p1378_p3, %p1880_p12 }
 0x2ba   : > { %p1384_p10 = por %p1383_p8, %p1382_p5 }
 0x2bb   : > { %p1380_p13 = pneg %p1379_p11 }
 0x2bc   : > { %p1386_p2 = por %p1385_p7, %p1384_p10 }
 0x2be   : > { %p1387_p4 = pnand %p1386_p2, %p1380_p13 }
 0x2c0   : > { %1390 = shalt.err (!%p1387_p4)
}
 0x2c1   : > { %s1494_s24 = smov 256   ;;  %s1495_s9 = smov 16  }
 0x2c2   : > { %1225 = dma.vmem_to_hbm [thread:$0]  (%p1880_p12), %s1792_s30, 4096, %s1790_s25, %s1800_s7, %s1494_s24, %s1494_s24, %s1495_s9  }
 0x2c3 PF: > { %p1236_p0 = scmp.ge.s32.totalorder %s1485_s28, 2  ;;  %s984_s8 = sand.u32 1, %s1445_s18  }
 0x2c4   : > { %p1881_p1 = scmp.ne.s32.totalorder %s1877_s21, 0  ;;  %s985_s10 = scalar_lea.sflag [#allocation4], %s984_s8 }
 0x2c6   : > { %p1232_p6 = pnand %p1236_p0, %p1881_p1 }
 0x2c8   : > { %1440 = dma.done.wait (!%p1232_p6), %s985_s10, 4096  }
 0x2c9   : > { %1442 = vsyncadd (!%p1232_p6), %s985_s10, 4294963200  ;;  %s21_s28 = sadd.s32 1, %s1485_s28   ;;  %s1882_s25 = sld [smem:[#allocation8_spill]] }
 0x2ca   : > { %p18_p9 = scmp.ge.s32.totalorder %s21_s28, 6   ;;  %s1883_s15 = sld [smem:[#allocation9_spill]] }
 0x2cb   : > { %s1884_s27 = sld [smem:[#allocation10_spill]]  ;;  %s1885_s18 = smov %s1449_s19 }
 0x2cc   : > { %s1886_s19 = smov %s1453_s20  ;;  %s1887_s20 = smov %s1616_s17 }
 0x2cd   : > { %s1888_s21 = smov %s1461_s22  ;;  %s1889_s22 = smov %s1465_s23 }
 0x2ce   : > { %s1890_s23 = smov %s1613_s16  ;;  %s1891_s24 = smov %s1477_s26 }
 0x2cf   :  { %20 = sbr.rel (!%p18_p9) target bundleno = 9 (0x9), region = 86 }
 0x2d0   : > { %s1892_s26 = smov %s1883_s15 }
 0x2d6   :  { %990 = vsyncpa [#allocation3], 1 }
 0x2d7   :  { %992 = vsyncpa [#allocation3 + $0x1], 1 }
 0x2d8   :  { %993 = vsyncpa [#allocation4], 1 }
 0x2d9   :  { %995 = vsyncpa [#allocation4 + $0x1], 1 }

</bundles_post_ra>
